<compile_context>
chip_gen: v7x
topology: tpu7x:2x2x1
jax: 0.10.0
libtpu: 0.0.40
codegen_flags: <defaults>
</compile_context>

<pallas_src>
import jax
import jax.numpy as jnp
from jax.experimental import pallas as pl
from jax.experimental.pallas import tpu as pltpu


def _round_up(x, m):
    return ((x + m - 1) // m) * m


def _conformity_kernel(x_ref, c_ref, wx_ref, wc_ref, b_ref, o_ref):
    # x_ref : (TM, E)  embeddings tile (native dtype)
    # c_ref : (TM, F)  conformity tile (original dtype, e.g. int32)
    # wx_ref: (E, O)   fc1 weight columns for embeddings (grid-invariant)
    # wc_ref: (F, O)   fc1 weight columns for conformity (grid-invariant)
    # b_ref : (1, O)   fc1 bias (grid-invariant)
    # o_ref : (TM, O)
    x = x_ref[...]
    conf = c_ref[...].astype(x.dtype)          # in-kernel ".float()" cast (VPU)
    acc = jnp.dot(x, wx_ref[...], preferred_element_type=jnp.float32)
    acc = acc + jnp.dot(conf, wc_ref[...].astype(x.dtype),
                        preferred_element_type=jnp.float32)
    o_ref[...] = (acc + b_ref[...].astype(jnp.float32)).astype(o_ref.dtype)


def conformity_forward(embeddings, conformity, weight, bias, *,
                       text_embedding_dim, tile_rows=1024):
    """Pallas implementation of ConformityModel.forward.

    embeddings : any shape reshapeable to (-1, text_embedding_dim)
    conformity : (B, features_vector_length), any dtype (cast to float in-kernel)
    weight     : (output_dim, text_embedding_dim + features_vector_length)
                 (PyTorch nn.Linear layout)
    bias       : (output_dim,)
    """
    E = int(text_embedding_dim)
    x = jnp.reshape(embeddings, (-1, E))       # .view(-1, E); no wrapper dtype cast
    B = x.shape[0]
    F = conformity.shape[-1]
    O = weight.shape[0]
    assert weight.shape[1] == E + F, "weight must be (O, E + F)"

    conf = jnp.reshape(conformity, (B, F))

    # One-time, tiny (O*(E+F) elements) weight transpose + split into the
    # canonical (K, N) MXU layout.  Negligible vs streaming B*E embeddings,
    # and it removes any per-grid-step weight relayout / in-kernel concat.
    w_t = jnp.transpose(weight)                # (E + F, O)
    w_x = w_t[:E]                              # (E, O)
    w_c = w_t[E:]                              # (F, O)
    b2d = jnp.reshape(bias, (1, O))

    out_dtype = jnp.result_type(x.dtype, weight.dtype)

    # Row tile: large multiple of 8 (sublane aligned), clamped for small batches.
    # TM=1024 keeps double-buffered f32 tiles well under the scoped VMEM limit
    # even at E=768 (1024*768*4B*2buf ≈ 6 MiB) — safe on v5e/v6e/v7x.
    TM = int(min(tile_rows, _round_up(max(B, 1), 8)))
    grid = (pl.cdiv(B, TM),)

    cost = pl.CostEstimate(
        flops=2 * B * (E + F) * O,
        transcendentals=0,
        bytes_accessed=int(
            x.size * x.dtype.itemsize
            + conf.size * conf.dtype.itemsize
            + weight.size * weight.dtype.itemsize
            + bias.size * bias.dtype.itemsize
            + B * O * jnp.dtype(out_dtype).itemsize),
    )

    return pl.pallas_call(
        _conformity_kernel,
        out_shape=jax.ShapeDtypeStruct((B, O), out_dtype),
        grid=grid,
        in_specs=[
            pl.BlockSpec((TM, E), lambda i: (i, 0)),   # embeddings: row-tiled
            pl.BlockSpec((TM, F), lambda i: (i, 0)),   # conformity: row-tiled
            pl.BlockSpec((E, O), lambda i: (0, 0)),    # W_x: grid-invariant
            pl.BlockSpec((F, O), lambda i: (0, 0)),    # W_c: grid-invariant
            pl.BlockSpec((1, O), lambda i: (0, 0)),    # bias: grid-invariant
        ],
        out_specs=pl.BlockSpec((TM, O), lambda i: (i, 0)),
        compiler_params=pltpu.CompilerParams(
            dimension_semantics=("parallel",)),        # megacore row split (v7x)
        cost_estimate=cost,
    )(x, conf, w_x, w_c, b2d)


def _reference(embeddings, conformity, weight, bias, *, text_embedding_dim):
    x = jnp.reshape(embeddings, (-1, text_embedding_dim)).astype(jnp.float32)
    conf = conformity.astype(jnp.float32)
    cat = jnp.concatenate([x, conf], axis=1)
    return cat @ weight.astype(jnp.float32).T + bias.astype(jnp.float32)


if __name__ == "__main__":
    key = jax.random.PRNGKey(0)
    k_emb, k_conf, k_w, k_b = jax.random.split(key, 4)

    # Small shapes consistent with the module.
    batch = 8
    text_embedding_dim = 32
    features_vector_length = 8
    output_dim = 16

    embeddings = jax.random.normal(
        k_emb, (batch, text_embedding_dim), jnp.float32)
    # conformity arrives as non-float (module calls .float()); use int32 here.
    conformity = jax.random.randint(
        k_conf, (batch, features_vector_length), 0, 3, jnp.int32)

    # Deterministic parameter init (uniform like nn.Linear default, fixed seed).
    fan_in = text_embedding_dim + features_vector_length
    bound = 1.0 / (fan_in ** 0.5)
    weight = jax.random.uniform(k_w, (output_dim, fan_in), jnp.float32, -bound, bound)
    bias = jax.random.uniform(k_b, (output_dim,), jnp.float32, -bound, bound)

    out = conformity_forward(embeddings, conformity, weight, bias,
                             text_embedding_dim=text_embedding_dim)
    out = jax.block_until_ready(out)

    ref = _reference(embeddings, conformity, weight, bias,
                     text_embedding_dim=text_embedding_dim)
    assert out.shape == (batch, output_dim)
    assert jnp.allclose(out, ref, atol=1e-5, rtol=1e-5), "mismatch vs reference"

    print("KERNEL_OK")
</pallas_src>

<mosaic_0001>
module attributes {stable_mosaic.version = 11 : i64} {
  func.func @_conformity_kernel(%arg0: i32, %arg1: memref<8x32xf32, #tpu.memory_space<vmem>>, %arg2: memref<8x8xi32, #tpu.memory_space<vmem>>, %arg3: memref<32x16xf32, #tpu.memory_space<vmem>>, %arg4: memref<8x16xf32, #tpu.memory_space<vmem>>, %arg5: memref<1x16xf32, #tpu.memory_space<vmem>>, %arg6: memref<8x16xf32, #tpu.memory_space<vmem>>) attributes {dimension_semantics = [#tpu.dimension_semantics<parallel>], iteration_bounds = array<i64: 1>, scalar_prefetch = 0 : i64, scratch_operands = 0 : i64, tpu.core_type = #tpu.core_type<tc>, window_params = [{transform_indices = @transform_0, window_bounds = array<i64: 8, 32>}, {transform_indices = @transform_1, window_bounds = array<i64: 8, 8>}, {pipeline_mode = #tpu.pipeline_mode<synchronous>, transform_indices = @transform_2, window_bounds = array<i64: 32, 16>}, {pipeline_mode = #tpu.pipeline_mode<synchronous>, transform_indices = @transform_3, window_bounds = array<i64: 8, 16>}, {pipeline_mode = #tpu.pipeline_mode<synchronous>, transform_indices = @transform_4, window_bounds = array<i64: 1, 16>}, {transform_indices = @transform_5, window_bounds = array<i64: 8, 16>}]} {
    %c0 = arith.constant 0 : index
    %c0_0 = arith.constant 0 : index
    %0 = vector.load %arg1[%c0, %c0_0] : memref<8x32xf32, #tpu.memory_space<vmem>>, vector<8x32xf32>
    %c0_1 = arith.constant 0 : index
    %c0_2 = arith.constant 0 : index
    %1 = vector.load %arg2[%c0_1, %c0_2] : memref<8x8xi32, #tpu.memory_space<vmem>>, vector<8x8xi32>
    %2 = arith.sitofp %1 : vector<8x8xi32> to vector<8x8xf32>
    %c0_3 = arith.constant 0 : index
    %c0_4 = arith.constant 0 : index
    %3 = vector.load %arg3[%c0_3, %c0_4] : memref<32x16xf32, #tpu.memory_space<vmem>>, vector<32x16xf32>
    %cst = arith.constant dense<0.000000e+00> : vector<8x16xf32>
    %4 = tpu.matmul %0, %3, %cst {dimension_numbers = #tpu.dot_dimension_numbers<[1], [0], [0], [1], [0, 0, 1, 1], [], []>} : vector<8x32xf32>, vector<32x16xf32>, vector<8x16xf32> -> vector<8x16xf32>
    %c0_5 = arith.constant 0 : index
    %c0_6 = arith.constant 0 : index
    %5 = vector.load %arg4[%c0_5, %c0_6] : memref<8x16xf32, #tpu.memory_space<vmem>>, vector<8x16xf32>
    %cst_7 = arith.constant dense<0.000000e+00> : vector<8x16xf32>
    %6 = tpu.matmul %2, %5, %cst_7 {dimension_numbers = #tpu.dot_dimension_numbers<[1], [0], [0], [1], [0, 0, 1, 1], [], []>} : vector<8x8xf32>, vector<8x16xf32>, vector<8x16xf32> -> vector<8x16xf32>
    %7 = arith.addf %4, %6 : vector<8x16xf32>
    %c0_8 = arith.constant 0 : index
    %c0_9 = arith.constant 0 : index
    %8 = vector.load %arg5[%c0_8, %c0_9] : memref<1x16xf32, #tpu.memory_space<vmem>>, vector<1x16xf32>
    %9 = vector.broadcast %8 : vector<1x16xf32> to vector<8x16xf32>
    %10 = arith.addf %7, %9 : vector<8x16xf32>
    %c0_10 = arith.constant 0 : index
    %c0_11 = arith.constant 0 : index
    %11 = vector.load %arg6[%c0_10, %c0_11] : memref<8x16xf32, #tpu.memory_space<vmem>>, vector<8x16xf32>
    tpu.vector_store %arg6[%c0_10, %c0_11], %10 {strides = array<i32>} : memref<8x16xf32, #tpu.memory_space<vmem>>, vector<8x16xf32>,
    return
  }
  func.func @transform_0(%arg0: i32) -> (i32, i32) {
    %c0_i32 = arith.constant 0 : i32
    %c0_i32_0 = arith.constant 0 : i32
    return %arg0, %c0_i32 : i32, i32
  }
  func.func @transform_1(%arg0: i32) -> (i32, i32) {
    %c0_i32 = arith.constant 0 : i32
    %c0_i32_0 = arith.constant 0 : i32
    return %arg0, %c0_i32 : i32, i32
  }
  func.func @transform_2(%arg0: i32) -> (i32, i32) {
    %c0_i32 = arith.constant 0 : i32
    %c0_i32_0 = arith.constant 0 : i32
    %c0_i32_1 = arith.constant 0 : i32
    return %c0_i32, %c0_i32_0 : i32, i32
  }
  func.func @transform_3(%arg0: i32) -> (i32, i32) {
    %c0_i32 = arith.constant 0 : i32
    %c0_i32_0 = arith.constant 0 : i32
    %c0_i32_1 = arith.constant 0 : i32
    return %c0_i32, %c0_i32_0 : i32, i32
  }
  func.func @transform_4(%arg0: i32) -> (i32, i32) {
    %c0_i32 = arith.constant 0 : i32
    %c0_i32_0 = arith.constant 0 : i32
    %c0_i32_1 = arith.constant 0 : i32
    return %c0_i32, %c0_i32_0 : i32, i32
  }
  func.func @transform_5(%arg0: i32) -> (i32, i32) {
    %c0_i32 = arith.constant 0 : i32
    %c0_i32_0 = arith.constant 0 : i32
    return %arg0, %c0_i32 : i32, i32
  }
}

</mosaic_0001>

<bundles_post_ra>
// kernel: tpu_custom_call.1
= control target key start
LH: loop header
LB: loop body
LE: loop exit
PB: predicated region body
PF: predicated region fallthrough
CT: control target
= control target key end

     0   :  { %v261_v3 = vmov 0.0|0.0   ;;  %v262_v5 = vmov 0.0   ;;  %vm29_vm0 = vcmask 64512   ;;  %vm263_vm1 = vmmov 0   ;;  %s331_s0 = inlined_call_operand.vmem [shape: f32[8,32], index: 0, kind: input, shape index: {}]   ;;  %s332_s1 = inlined_call_operand.vmem [shape: s32[8,8], index: 1, kind: input, shape index: {}]   ;;  %s333_s2 = inlined_call_operand.vmem [shape: f32[32,16], index: 2, kind: input, shape index: {}]   ;;  %s334_s3 = inlined_call_operand.vmem [shape: f32[8,16], index: 3, kind: input, shape index: {}]   ;;  %s335_s4 = inlined_call_operand.vmem [shape: f32[1,16], index: 4, kind: input, shape index: {}]   ;;  %s336_s5 = inlined_call_operand.hbm [shape: f32[8,16], index: 5, kind: output, shape index: {}]  }
   0x1   :  { %v24_v0 = vld [vmem:[%s333_s2] sm:$0xff]  ;;  %v25_v1 = vld [vmem:[%s333_s2 + $0x8] sm:$0xff]  ;;  %v26_v2 = vld [vmem:[%s333_s2 + $0x10] sm:$0xff]  ;;  %227 = vmatprep.subr.bf16.mxu1 %v261_v3  ;;  %211 = vmatprep.subr.mxu0 %v262_v5 }
   0x2   :  { %v228_v4 = vpack.c.bf16 %v25_v1, %v24_v0  ;;  %v27_v6 = vld [vmem:[%s333_s2 + $0x18] sm:$0xff]  ;;  %v28_v7 = vld [vmem:[%s334_s3] sm:$0xff]  ;;  %213 = vmatprep.mubr.msk.f32.mxu0 %vm263_vm1, %v262_v5 }
   0x3   :  { %v22_v8 = vld [vmem:[%s332_s1] sm:$0xff]  ;;  %212 = vmatpush3.msra.mxu0 %v28_v7 }
   0x4   :  { %v23_v9 = vcvt.s32.f32 %v22_v8 }
   0x5   :  { %10 = vsyncpa [#allocation3], 0  ;;  %229 = vmatpush3.bf16.msra.mxu1 %v228_v4  ;;  %v231_v10 = vpack.c.bf16 %v27_v6, %v26_v2  ;;  %224 = vmatprep.mubr.msk.f32.mxu1 %vm263_vm1, %v262_v5  ;;  %v21_v11 = vld [vmem:[%s331_s0] sm:$0xff]  ;;  %vm103_vm2 = vcmask 261120   ;;  %s264_s6 = smov [#allocation2]   ;;  %vm185_vm3 = vcmask 130048  }
   0x6   :  { %230 = vmatprep.subr.bf16.mxu1 %v261_v3  ;;  %214 = vmatmul.mubr.msk.f32.vlgmr.msra.gmra.mrb[0].mxu0 %vm29_vm0, %v23_v9  ;;  %v203_v15 = vld [vmem:[%s335_s4] ss:$0 sm:$0xff]  ;;  %s193_s7 = sshll.u32 %s264_s6, 4  ;;  %s194_s7 = int_to_ptr.vmem [resolvable:$true] %s193_s7 }
   0x7   :  { %s237_s8 = scalar_lea.vmem %s194_s7, 128  ;;  %p242_p1 = scmp.lt.s32.totalorder %s194_s7, %s194_s7 }
   0x8   :  { %p238_p0 = scmp.ne.s32.totalorder %s194_s7, %s237_s8  ;;  %p243_p2 = scmp.lt.s32.totalorder %s237_s8, %s237_s8 }
   0x9   :  { %232 = vmatpush3.bf16.msra.mxu1 %v231_v10 }
   0xa   :  { %p244_p3 = por %p243_p2, %p242_p1 }
   0xc   :  { %225 = vmatmul.mubr.msk.f32.vlgmr.msra.gmra.mrb[0].mxu1 %vm103_vm2, %v21_v11  ;;  %p245_p4 = pnand %p244_p3, %p238_p0 }
  0xd9   :  { %v99_v12 = vpop.f32.mrb[0].mxu0 }
  0xda   :  { %v215_v13 = vpop.f32.mrb[1].mxu0 }
  0xdf   :  { %v173_v14 = vpop.f32.mrb[0].mxu1 }
  0xe0   :  { %v174_v16 = vadd.f32 %v173_v14, %v99_v12  ;;  %v226_v17 = vpop.f32.mrb[1].mxu1 }
  0xe2   :  { %v184_v18 = vadd.f32 %v203_v15, %v174_v16 }
  0xe4   :  { %186 = vst.msk [vmem:[#allocation2] sm:$0xff] %vm185_vm3, %v184_v18 }
  0xe5   :  { %248 = shalt.err (!%p245_p4)
}
  0xe6   :  { %s249_s10 = scalar_lea.hbm %s336_s5, 128 }
  0xe7   :  { %p250_p5 = scmp.ne.s32.totalorder %s336_s5, %s249_s10  ;;  %p253_p6 = scmp.lt.u32.totalorder %s249_s10, %s336_s5 }
  0xe9   :  { %p255_p7 = pnand %p253_p6, %p250_p5 }
  0xeb   :  { %258 = shalt.err (!%p255_p7)
}
  0xec   :  { %196 = dma.vmem_to_hbm [thread:$0]  %s194_s7, 128, %s336_s5, [#allocation3]  }
  0xed   :  { %259 = dma.done.wait [#allocation3], 128  }
  0xee   :  { %260 = vsyncadd [#allocation3], 4294967168 }
  0xef   :  { %200 = vsyncpa [#allocation3], 1 }

</bundles_post_ra>
